<compile_context>
chip_gen: v6e
topology: v6e:2x2x1
jax: 0.10.0
libtpu: 0.0.40
codegen_flags: <defaults>
</compile_context>

<pallas_src>
import jax
import jax.numpy as jnp
import numpy as np
from jax.experimental import pallas as pl
from jax.experimental.pallas import tpu as pltpu


def _make_double_conv_kernel(Mb):
    """Kernel body: one (Nb*H, W*C) slab (Nb whole images) per grid step.

    Refs (all VMEM):
      x_ref    : (Mb, W*Cin)          bf16 lane-dense input slab
      B1_ref   : (3, W*Cin, W*Cmid)   bf16 banded conv1 weights (BN1 folded in)
      b1_ref   : (1, W*Cmid)          f32 BN1 bias, tiled across W
      B2_ref   : (3, W*Cmid, W*Cout)  bf16 banded conv2 weights (BN2 folded in)
      b2_ref   : (1, W*Cout)          f32 BN2 bias, tiled across W
      ktop_ref : (Mb, 1)              f32 keep-mask: 0 on image-top rows
      kbot_ref : (Mb, 1)              f32 keep-mask: 0 on image-bottom rows
      o_ref    : (Mb, W*Cout)         f32 lane-dense output slab
    """

    def kernel(x_ref, B1_ref, b1_ref, B2_ref, b2_ref, ktop_ref, kbot_ref, o_ref):
        ktop = ktop_ref[...]
        kbot = kbot_ref[...]

        def conv_bn_relu(a, B_ref, b_ref):
            # Three bf16 MXU matmuls (one per kernel row dy), f32 accumulation.
            p0 = jnp.dot(a, B_ref[0], preferred_element_type=jnp.float32)
            p1 = jnp.dot(a, B_ref[1], preferred_element_type=jnp.float32)
            p2 = jnp.dot(a, B_ref[2], preferred_element_type=jnp.float32)
            # Shift the dy=0 / dy=2 partials by one image row (XLU sublane
            # roll) and zero the rows whose 3x3 stencil would cross an image
            # boundary -- this implements the H-direction zero padding.
            up = ktop * pltpu.roll(p0, shift=1, axis=0)        # row r <- p0[r-1]
            dn = kbot * pltpu.roll(p2, shift=Mb - 1, axis=0)   # row r <- p2[r+1]
            # Folded-BN bias + ReLU epilogue; Dropout(p=0.0) is the identity.
            return jnp.maximum(up + p1 + dn + b_ref[...], 0.0)

        y = conv_bn_relu(x_ref[...], B1_ref, b1_ref)              # f32 (Mb, W*Cmid)
        z = conv_bn_relu(y.astype(jnp.bfloat16), B2_ref, b2_ref)  # f32 (Mb, W*Cout)
        o_ref[...] = z.astype(o_ref.dtype)

    return kernel


def _fold_bn(gamma, beta, mean, var, eps=1e-5):
    scale = gamma / jnp.sqrt(var + eps)
    bias = beta - mean * scale
    return scale.astype(jnp.float32), bias.astype(jnp.float32)


def _banded_weights(w_hwio, scale, W, dtype=jnp.bfloat16):
    """(3,3,Ci,Co) conv weights (+ folded BN scale along Co) -> (3, W*Ci, W*Co)
    banded block matrices.  Block (win, wout) of B[dy] equals w[dy, dx]*scale
    with dx = win - wout + 1 when 0 <= dx <= 2, and zero otherwise -- i.e. the
    W-direction taps and the W zero-padding are baked into the matrix."""
    kH, kW, Ci, Co = w_hwio.shape
    wf = w_hwio.astype(jnp.float32) * scale[None, None, None, :]
    mats = []
    for dy in range(kH):
        m = jnp.zeros((W * Ci, W * Co), jnp.float32)
        for dx in range(kW):
            shift = jnp.eye(W, k=1 - dx, dtype=jnp.float32)
            m = m + jnp.kron(shift, wf[dy, dx])
        mats.append(m)
    return jnp.stack(mats, axis=0).astype(dtype)


def double_conv_pallas(x_nchw, w1_hwio, bn1, w2_hwio, bn2, eps=1e-5,
                       batch_block=8):
    """x_nchw: (N, Cin, H, W) float32. Returns (N, Cout, H, W) float32."""
    N, Cin, H, W = x_nchw.shape
    Cmid = w1_hwio.shape[-1]
    Cout = w2_hwio.shape[-1]

    # The banded-matrix trick multiplies (W*C)-wide operands; only viable while
    # the lane extents stay small (it is 3/W dense and scales as W^2*Ci*Co).
    assert W * max(Cin, Cmid, Cout) <= 512, "banded conv trick only for small W*C"

    # Per-step sub-batch: a big M amortizes per-step pipeline overhead, but
    # keep >= 2 grid steps so both v7x TensorCores get work.
    Nb = max(1, min(batch_block, N))
    if N >= 2 and N // Nb < 2:
        Nb = max(1, N // 2)
    Ng = -(-N // Nb)                 # grid steps
    N_pad = Ng * Nb
    Mb = Nb * H                      # matmul M per grid step

    # NCHW -> lane-dense (N*H, W*Cin) bf16 rows (lane order: w-major, c-minor).
    x = jnp.transpose(x_nchw, (0, 2, 3, 1)).astype(jnp.bfloat16)
    x = x.reshape(N, H, W * Cin)
    if N_pad != N:
        x = jnp.pad(x, ((0, N_pad - N), (0, 0), (0, 0)))
    x = x.reshape(N_pad * H, W * Cin)

    s1, b1 = _fold_bn(*bn1, eps=eps)
    s2, b2 = _fold_bn(*bn2, eps=eps)
    B1 = _banded_weights(w1_hwio, s1, W)             # (3, W*Cin,  W*Cmid) bf16
    B2 = _banded_weights(w2_hwio, s2, W)             # (3, W*Cmid, W*Cout) bf16
    b1_t = jnp.tile(b1, W).reshape(1, W * Cmid)      # f32, w-major lane order
    b2_t = jnp.tile(b2, W).reshape(1, W * Cout)

    # Keep-masks for the H-direction zero padding: row r of the (Nb*H)-row slab
    # is the top (bottom) row of its image iff r % H == 0 (H-1); those rows'
    # dy=0 (dy=2) contributions must be zeroed.  Image boundaries land at the
    # same offsets in every grid step, so the masks are grid-invariant.
    ridx = np.arange(Mb) % H
    keep_top = jnp.asarray((ridx != 0).astype(np.float32)).reshape(Mb, 1)
    keep_bot = jnp.asarray((ridx != H - 1).astype(np.float32)).reshape(Mb, 1)

    kernel = _make_double_conv_kernel(Mb)

    out = pl.pallas_call(
        kernel,
        out_shape=jax.ShapeDtypeStruct((N_pad * H, W * Cout), jnp.float32),
        grid_spec=pltpu.PrefetchScalarGridSpec(
            num_scalar_prefetch=0,
            grid=(Ng,),
            in_specs=[
                pl.BlockSpec((Mb, W * Cin), lambda n: (n, 0)),
                pl.BlockSpec((3, W * Cin, W * Cmid), lambda n: (0, 0, 0)),
                pl.BlockSpec((1, W * Cmid), lambda n: (0, 0)),
                pl.BlockSpec((3, W * Cmid, W * Cout), lambda n: (0, 0, 0)),
                pl.BlockSpec((1, W * Cout), lambda n: (0, 0)),
                pl.BlockSpec((Mb, 1), lambda n: (0, 0)),
                pl.BlockSpec((Mb, 1), lambda n: (0, 0)),
            ],
            out_specs=pl.BlockSpec((Mb, W * Cout), lambda n: (n, 0)),
        ),
        compiler_params=pltpu.CompilerParams(
            dimension_semantics=("parallel",)),
    )(x, B1, b1_t, B2, b2_t, keep_top, keep_bot)

    out = out[:N * H].reshape(N, H, W, Cout)
    return jnp.transpose(out, (0, 3, 1, 2))


def double_conv_reference(x_nchw, w1_hwio, bn1, w2_hwio, bn2, eps=1e-5):
    """Pure-JAX f32 reference (eval-mode BN, dropout p=0.0)."""
    x = jnp.transpose(x_nchw, (0, 2, 3, 1)).astype(jnp.float32)
    dn = ("NHWC", "HWIO", "NHWC")

    y = jax.lax.conv_general_dilated(x, w1_hwio, (1, 1), "SAME",
                                     dimension_numbers=dn)
    g, b, m, v = bn1
    y = (y - m) / jnp.sqrt(v + eps) * g + b
    y = jnp.maximum(y, 0.0)

    z = jax.lax.conv_general_dilated(y, w2_hwio, (1, 1), "SAME",
                                     dimension_numbers=dn)
    g, b, m, v = bn2
    z = (z - m) / jnp.sqrt(v + eps) * g + b
    z = jnp.maximum(z, 0.0)
    return jnp.transpose(z, (0, 3, 1, 2))


if __name__ == "__main__":
    # DoubleConv(in_channels=4, out_channels=8); batch chosen to exercise the
    # batch-folded grid: Nb=8 -> M=128 per step, grid=(2,) (one step per v7x TC).
    N, Cin, H, W = 16, 4, 16, 16
    Cmid = Cout = 8  # mid_channels defaults to out_channels

    key = jax.random.PRNGKey(0)
    ks = jax.random.split(key, 11)

    x = jax.random.normal(ks[0], (N, Cin, H, W), dtype=jnp.float32)

    # Conv weights generated directly in HWIO layout: (3, 3, Ci, Co)
    w1 = jax.random.normal(ks[1], (3, 3, Cin, Cmid), jnp.float32) / np.sqrt(Cin * 9)
    w2 = jax.random.normal(ks[2], (3, 3, Cmid, Cout), jnp.float32) / np.sqrt(Cmid * 9)

    # BatchNorm parameters + running stats (eval-mode semantics)
    bn1 = (jax.random.uniform(ks[3], (Cmid,), jnp.float32, 0.5, 1.5),   # gamma
           0.1 * jax.random.normal(ks[4], (Cmid,), jnp.float32),        # beta
           0.1 * jax.random.normal(ks[5], (Cmid,), jnp.float32),        # running_mean
           jax.random.uniform(ks[6], (Cmid,), jnp.float32, 0.5, 1.5))   # running_var
    bn2 = (jax.random.uniform(ks[7], (Cout,), jnp.float32, 0.5, 1.5),
           0.1 * jax.random.normal(ks[8], (Cout,), jnp.float32),
           0.1 * jax.random.normal(ks[9], (Cout,), jnp.float32),
           jax.random.uniform(ks[10], (Cout,), jnp.float32, 0.5, 1.5))

    out = jax.block_until_ready(double_conv_pallas(x, w1, bn1, w2, bn2))
    ref = jax.block_until_ready(double_conv_reference(x, w1, bn1, w2, bn2))

    # Kernel runs both convs with bf16 MXU operands (f32 accumulation); compare
    # against the pure-f32 reference with bf16-appropriate tolerance.
    np.testing.assert_allclose(np.asarray(out), np.asarray(ref),
                               rtol=5e-2, atol=5e-2)

    print("KERNEL_OK")
</pallas_src>

<mosaic_0001>
module attributes {stable_mosaic.version = 11 : i64} {
  func.func @kernel(%arg0: i32, %arg1: memref<128x64xbf16, #tpu.memory_space<vmem>>, %arg2: memref<3x64x128xbf16, #tpu.memory_space<vmem>>, %arg3: memref<1x128xf32, #tpu.memory_space<vmem>>, %arg4: memref<3x128x128xbf16, #tpu.memory_space<vmem>>, %arg5: memref<1x128xf32, #tpu.memory_space<vmem>>, %arg6: memref<128x1xf32, #tpu.memory_space<vmem>>, %arg7: memref<128x1xf32, #tpu.memory_space<vmem>>, %arg8: memref<128x128xf32, #tpu.memory_space<vmem>>) attributes {dimension_semantics = [#tpu.dimension_semantics<parallel>], iteration_bounds = array<i64: 2>, scalar_prefetch = 0 : i64, scratch_operands = 0 : i64, tpu.core_type = #tpu.core_type<tc>, window_params = [{transform_indices = @transform_0, window_bounds = array<i64: 128, 64>}, {pipeline_mode = #tpu.pipeline_mode<synchronous>, transform_indices = @transform_1, window_bounds = array<i64: 3, 64, 128>}, {pipeline_mode = #tpu.pipeline_mode<synchronous>, transform_indices = @transform_2, window_bounds = array<i64: 1, 128>}, {pipeline_mode = #tpu.pipeline_mode<synchronous>, transform_indices = @transform_3, window_bounds = array<i64: 3, 128, 128>}, {pipeline_mode = #tpu.pipeline_mode<synchronous>, transform_indices = @transform_4, window_bounds = array<i64: 1, 128>}, {pipeline_mode = #tpu.pipeline_mode<synchronous>, transform_indices = @transform_5, window_bounds = array<i64: 128, 1>}, {pipeline_mode = #tpu.pipeline_mode<synchronous>, transform_indices = @transform_6, window_bounds = array<i64: 128, 1>}, {transform_indices = @transform_7, window_bounds = array<i64: 128, 128>}]} {
    %c0 = arith.constant 0 : index
    %c0_0 = arith.constant 0 : index
    %0 = vector.load %arg6[%c0, %c0_0] : memref<128x1xf32, #tpu.memory_space<vmem>>, vector<128x1xf32>
    %c0_1 = arith.constant 0 : index
    %c0_2 = arith.constant 0 : index
    %1 = vector.load %arg7[%c0_1, %c0_2] : memref<128x1xf32, #tpu.memory_space<vmem>>, vector<128x1xf32>
    %c0_3 = arith.constant 0 : index
    %c0_4 = arith.constant 0 : index
    %2 = vector.load %arg1[%c0_3, %c0_4] : memref<128x64xbf16, #tpu.memory_space<vmem>>, vector<128x64xbf16>
    %c0_5 = arith.constant 0 : index
    %c0_6 = arith.constant 0 : index
    %c0_7 = arith.constant 0 : index
    %3 = vector.load %arg2[%c0_5, %c0_6, %c0_7] : memref<3x64x128xbf16, #tpu.memory_space<vmem>>, vector<1x64x128xbf16>
    %4 = vector.shape_cast %3 : vector<1x64x128xbf16> to vector<64x128xbf16>
    %cst = arith.constant dense<0.000000e+00> : vector<128x128xf32>
    %5 = tpu.matmul %2, %4, %cst {dimension_numbers = #tpu.dot_dimension_numbers<[1], [0], [0], [1], [0, 0, 1, 1], [], []>} : vector<128x64xbf16>, vector<64x128xbf16>, vector<128x128xf32> -> vector<128x128xf32>
    %c1 = arith.constant 1 : index
    %c0_8 = arith.constant 0 : index
    %c0_9 = arith.constant 0 : index
    %6 = vector.load %arg2[%c1, %c0_8, %c0_9] : memref<3x64x128xbf16, #tpu.memory_space<vmem>>, vector<1x64x128xbf16>
    %7 = vector.shape_cast %6 : vector<1x64x128xbf16> to vector<64x128xbf16>
    %cst_10 = arith.constant dense<0.000000e+00> : vector<128x128xf32>
    %8 = tpu.matmul %2, %7, %cst_10 {dimension_numbers = #tpu.dot_dimension_numbers<[1], [0], [0], [1], [0, 0, 1, 1], [], []>} : vector<128x64xbf16>, vector<64x128xbf16>, vector<128x128xf32> -> vector<128x128xf32>
    %c2 = arith.constant 2 : index
    %c0_11 = arith.constant 0 : index
    %c0_12 = arith.constant 0 : index
    %9 = vector.load %arg2[%c2, %c0_11, %c0_12] : memref<3x64x128xbf16, #tpu.memory_space<vmem>>, vector<1x64x128xbf16>
    %10 = vector.shape_cast %9 : vector<1x64x128xbf16> to vector<64x128xbf16>
    %cst_13 = arith.constant dense<0.000000e+00> : vector<128x128xf32>
    %11 = tpu.matmul %2, %10, %cst_13 {dimension_numbers = #tpu.dot_dimension_numbers<[1], [0], [0], [1], [0, 0, 1, 1], [], []>} : vector<128x64xbf16>, vector<64x128xbf16>, vector<128x128xf32> -> vector<128x128xf32>
    %c1_i32 = arith.constant 1 : i32
    %12 = tpu.dynamic_rotate %5 by %c1_i32 dim 0 : vector<128x128xf32>, i32 -> vector<128x128xf32>
    %13 = vector.broadcast %0 : vector<128x1xf32> to vector<128x128xf32>
    %14 = arith.mulf %13, %12 : vector<128x128xf32>
    %c127_i32 = arith.constant 127 : i32
    %15 = tpu.dynamic_rotate %11 by %c127_i32 dim 0 : vector<128x128xf32>, i32 -> vector<128x128xf32>
    %16 = vector.broadcast %1 : vector<128x1xf32> to vector<128x128xf32>
    %17 = arith.mulf %16, %15 : vector<128x128xf32>
    %18 = arith.addf %14, %8 : vector<128x128xf32>
    %19 = arith.addf %18, %17 : vector<128x128xf32>
    %c0_14 = arith.constant 0 : index
    %c0_15 = arith.constant 0 : index
    %20 = vector.load %arg3[%c0_14, %c0_15] : memref<1x128xf32, #tpu.memory_space<vmem>>, vector<1x128xf32>
    %21 = vector.broadcast %20 : vector<1x128xf32> to vector<128x128xf32>
    %22 = arith.addf %19, %21 : vector<128x128xf32>
    %cst_16 = arith.constant 0.000000e+00 : f32
    %23 = vector.broadcast %cst_16 : f32 to vector<128x128xf32>
    %24 = arith.maximumf %22, %23 : vector<128x128xf32>
    %25 = arith.truncf %24 : vector<128x128xf32> to vector<128x128xbf16>
    %c0_17 = arith.constant 0 : index
    %c0_18 = arith.constant 0 : index
    %c0_19 = arith.constant 0 : index
    %26 = vector.load %arg4[%c0_17, %c0_18, %c0_19] : memref<3x128x128xbf16, #tpu.memory_space<vmem>>, vector<1x128x128xbf16>
    %27 = vector.shape_cast %26 : vector<1x128x128xbf16> to vector<128x128xbf16>
    %cst_20 = arith.constant dense<0.000000e+00> : vector<128x128xf32>
    %28 = tpu.matmul %25, %27, %cst_20 {dimension_numbers = #tpu.dot_dimension_numbers<[1], [0], [0], [1], [0, 0, 1, 1], [], []>} : vector<128x128xbf16>, vector<128x128xbf16>, vector<128x128xf32> -> vector<128x128xf32>
    %c1_21 = arith.constant 1 : index
    %c0_22 = arith.constant 0 : index
    %c0_23 = arith.constant 0 : index
    %29 = vector.load %arg4[%c1_21, %c0_22, %c0_23] : memref<3x128x128xbf16, #tpu.memory_space<vmem>>, vector<1x128x128xbf16>
    %30 = vector.shape_cast %29 : vector<1x128x128xbf16> to vector<128x128xbf16>
    %cst_24 = arith.constant dense<0.000000e+00> : vector<128x128xf32>
    %31 = tpu.matmul %25, %30, %cst_24 {dimension_numbers = #tpu.dot_dimension_numbers<[1], [0], [0], [1], [0, 0, 1, 1], [], []>} : vector<128x128xbf16>, vector<128x128xbf16>, vector<128x128xf32> -> vector<128x128xf32>
    %c2_25 = arith.constant 2 : index
    %c0_26 = arith.constant 0 : index
    %c0_27 = arith.constant 0 : index
    %32 = vector.load %arg4[%c2_25, %c0_26, %c0_27] : memref<3x128x128xbf16, #tpu.memory_space<vmem>>, vector<1x128x128xbf16>
    %33 = vector.shape_cast %32 : vector<1x128x128xbf16> to vector<128x128xbf16>
    %cst_28 = arith.constant dense<0.000000e+00> : vector<128x128xf32>
    %34 = tpu.matmul %25, %33, %cst_28 {dimension_numbers = #tpu.dot_dimension_numbers<[1], [0], [0], [1], [0, 0, 1, 1], [], []>} : vector<128x128xbf16>, vector<128x128xbf16>, vector<128x128xf32> -> vector<128x128xf32>
    %c1_i32_29 = arith.constant 1 : i32
    %35 = tpu.dynamic_rotate %28 by %c1_i32_29 dim 0 : vector<128x128xf32>, i32 -> vector<128x128xf32>
    %36 = vector.broadcast %0 : vector<128x1xf32> to vector<128x128xf32>
    %37 = arith.mulf %36, %35 : vector<128x128xf32>
    %c127_i32_30 = arith.constant 127 : i32
    %38 = tpu.dynamic_rotate %34 by %c127_i32_30 dim 0 : vector<128x128xf32>, i32 -> vector<128x128xf32>
    %39 = vector.broadcast %1 : vector<128x1xf32> to vector<128x128xf32>
    %40 = arith.mulf %39, %38 : vector<128x128xf32>
    %41 = arith.addf %37, %31 : vector<128x128xf32>
    %42 = arith.addf %41, %40 : vector<128x128xf32>
    %c0_31 = arith.constant 0 : index
    %c0_32 = arith.constant 0 : index
    %43 = vector.load %arg5[%c0_31, %c0_32] : memref<1x128xf32, #tpu.memory_space<vmem>>, vector<1x128xf32>
    %44 = vector.broadcast %43 : vector<1x128xf32> to vector<128x128xf32>
    %45 = arith.addf %42, %44 : vector<128x128xf32>
    %cst_33 = arith.constant 0.000000e+00 : f32
    %46 = vector.broadcast %cst_33 : f32 to vector<128x128xf32>
    %47 = arith.maximumf %45, %46 : vector<128x128xf32>
    %c0_34 = arith.constant 0 : index
    %c0_35 = arith.constant 0 : index
    %48 = vector.load %arg8[%c0_34, %c0_35] : memref<128x128xf32, #tpu.memory_space<vmem>>, vector<128x128xf32>
    tpu.vector_store %arg8[%c0_34, %c0_35], %47 {strides = array<i32>} : memref<128x128xf32, #tpu.memory_space<vmem>>, vector<128x128xf32>,
    return
  }
  func.func @transform_0(%arg0: i32) -> (i32, i32) {
    %c0_i32 = arith.constant 0 : i32
    %c0_i32_0 = arith.constant 0 : i32
    return %arg0, %c0_i32 : i32, i32
  }
  func.func @transform_1(%arg0: i32) -> (i32, i32, i32) {
    %c0_i32 = arith.constant 0 : i32
    %c0_i32_0 = arith.constant 0 : i32
    %c0_i32_1 = arith.constant 0 : i32
    %c0_i32_2 = arith.constant 0 : i32
    return %c0_i32, %c0_i32_0, %c0_i32_1 : i32, i32, i32
  }
  func.func @transform_2(%arg0: i32) -> (i32, i32) {
    %c0_i32 = arith.constant 0 : i32
    %c0_i32_0 = arith.constant 0 : i32
    %c0_i32_1 = arith.constant 0 : i32
    return %c0_i32, %c0_i32_0 : i32, i32
  }
  func.func @transform_3(%arg0: i32) -> (i32, i32, i32) {
    %c0_i32 = arith.constant 0 : i32
    %c0_i32_0 = arith.constant 0 : i32
    %c0_i32_1 = arith.constant 0 : i32
    %c0_i32_2 = arith.constant 0 : i32
    return %c0_i32, %c0_i32_0, %c0_i32_1 : i32, i32, i32
  }
  func.func @transform_4(%arg0: i32) -> (i32, i32) {
    %c0_i32 = arith.constant 0 : i32
    %c0_i32_0 = arith.constant 0 : i32
    %c0_i32_1 = arith.constant 0 : i32
    return %c0_i32, %c0_i32_0 : i32, i32
  }
  func.func @transform_5(%arg0: i32) -> (i32, i32) {
    %c0_i32 = arith.constant 0 : i32
    %c0_i32_0 = arith.constant 0 : i32
    %c0_i32_1 = arith.constant 0 : i32
    return %c0_i32, %c0_i32_0 : i32, i32
  }
  func.func @transform_6(%arg0: i32) -> (i32, i32) {
    %c0_i32 = arith.constant 0 : i32
    %c0_i32_0 = arith.constant 0 : i32
    %c0_i32_1 = arith.constant 0 : i32
    return %c0_i32, %c0_i32_0 : i32, i32
  }
  func.func @transform_7(%arg0: i32) -> (i32, i32) {
    %c0_i32 = arith.constant 0 : i32
    %c0_i32_0 = arith.constant 0 : i32
    return %arg0, %c0_i32 : i32, i32
  }
}

</mosaic_0001>

<bundles_post_ra>
// kernel: tpu_custom_call.1
= control target key start
LH: loop header
LB: loop body
LE: loop exit
PB: predicated region body
PF: predicated region fallthrough
CT: control target
= control target key end

     0   :  { %12 = vsyncpa [#allocation3], 0  ;;  %s3295_s0 = inlined_call_operand.vmem [shape: bf16[256,64], index: 0, kind: input, shape index: {}]   ;;  %s3296_s1 = inlined_call_operand.vmem [shape: bf16[3,64,128], index: 1, kind: input, shape index: {}]   ;;  %s3297_s2 = inlined_call_operand.vmem [shape: f32[1,128], index: 2, kind: input, shape index: {}]   ;;  %s3298_s3 = inlined_call_operand.vmem [shape: bf16[3,128,128], index: 3, kind: input, shape index: {}]   ;;  %s3299_s4 = inlined_call_operand.vmem [shape: f32[1,128], index: 4, kind: input, shape index: {}]   ;;  %s3300_s5 = inlined_call_operand.vmem [shape: f32[128,1], index: 5, kind: input, shape index: {}]   ;;  %s3301_s6 = inlined_call_operand.vmem [shape: f32[128,1], index: 6, kind: input, shape index: {}]   ;;  %s3302_s7 = inlined_call_operand.hbm [shape: f32[256,128], index: 7, kind: output, shape index: {}]  }
   0x1   :  { %14 = vsyncpa [#allocation3 + $0x1], 0  ;;  %s2443_s24 = smov 0   ;;  %s2445_s25 = smov 0  }
   0x2   :  { %s2447_s26 = smov 0   ;;  %s2449_s27 = smov 0  }
   0x3 LB: > { %s2464_s28 = sadd.s32 4294967295, %s2397_s27   ;;  %s1866_s29 = sadd.s32 4294967294, %s2397_s27   ;;  %s2397_s27 = sphi %s2449_s27, %s3329_s27   ;;  %s2393_s26 = sphi %s2447_s26, %s3328_s26   ;;  %s2389_s25 = sphi %s2445_s25, %s3327_s25   ;;  %s2385_s24 = sphi %s2443_s24, %s3326_s24  }
   0x4   : > { %s2468_s30 = sadd.s32 1, %s2397_s27   ;;  %s179_s8 = sadd.s32 1, %s2393_s26 }
   0x5   : > { %s176_s9 = ssub.s32 %s2397_s27, %s2468_s30  ;;  %p189_p0 = scmp.ne.s32.totalorder %s2393_s26, %s2389_s25 }
   0x6   : > { %p177_p1 = scmp.eq.s32.totalorder %s176_s9, 0  ;;  %p190_p2 = scmp.eq.s32.totalorder %s2464_s28, 1 }
   0x7   : > { %p195_p3 = scmp.ne.s32.totalorder %s2389_s25, %s2385_s24  ;;  %p196_p4 = scmp.eq.s32.totalorder %s1866_s29, 1 }
   0x8   : > { %s2479_s10 = scalar_select %p177_p1, %s2393_s26, %s179_s8  }
   0x9   : > { %p2481_p5 = por %p190_p2, %p189_p0  ;;  %p2485_p6 = por %p196_p4, %p195_p3 }
   0xa   : > { %p1869_p7 = scmp.ge.s32.totalorder %s2397_s27, 1  ;;  %p241_p8 = scmp.lt.s32.totalorder %s2397_s27, 3 }
   0xc   : > { %p242_p9 = pnand %p1869_p7, %p241_p8 }
   0xe   : > { %245 = sbr.rel (%p242_p9) target bundleno = 566 (0x236), region = 48 }
  0x13   : > { %v2293_v0 = vld [vmem:[%s3296_s1 + $0x18] sm:$0xff]   ;;  %s1871_s15 = sshll.u32 %s2464_s28, 4  ;;  %v2294_v1 = vld [vmem:[%s3296_s1 + $0x10] sm:$0xff]   ;;  %v2296_v3 = vld [vmem:[%s3296_s1 + $0x8] sm:$0xff]   ;;  %v2399_v5 = vmov 0   ;;  %vm401_vm0 = vcmask 523264  }
  0x14   : > { %p274_p10 = scmp.lt.s32.totalorder %s1871_s15, 31  ;;  %2081 = vmatprep.subr.bf16.mxu0 %v2293_v0  ;;  %v2295_v2 = vld [vmem:[%s3296_s1 + $0x38] sm:$0xff]   ;;  %v2297_v4 = vld [vmem:[%s3296_s1 + $0x30] sm:$0xff]   ;;  %2292 = vset.pattern.permute.xlu1 %v2399_v5  ;;  %v2299_v6 = vld [vmem:[%s3296_s1 + $0x28] sm:$0xff]   ;;  %s1996_s23 = sshll.u32 %s2464_s28, 11 }
  0x15   : > { %2082 = vmatpush3.bf16.msra.mxu0 %v2293_v0  ;;  %2105 = vmatprep.subr.bf16.mxu1 %v2295_v2  ;;  %v2298_v8 = vld [vmem:[%s3296_s1] sm:$0xff]   ;;  %v2302_v10 = vld [vmem:[%s3296_s1 + $0x58] sm:$0xff]   ;;  %v2306_v13 = vld [vmem:[%s3296_s1 + $0x50] sm:$0xff]   ;;  %s3245_s13 = scalar_lea.hbm %s3302_s7, %s1996_s23 }
  0x16   : > { %s3331_s15 = smov (!%p274_p10, %s1871_s15), 31  ;;  %2083 = vmatprep.subr.bf16.mxu0 %v2294_v1  ;;  %2106 = vmatpush3.bf16.msra.mxu1 %v2295_v2  ;;  %v2303_v9 = vld [vmem:[%s3296_s1 + $0x20] sm:$0xff]   ;;  %v283_v14 = vld [vmem:[%s3300_s5 + $0x10] sm:$0xff]  ;;  %v284_v16 = vld [vmem:[%s3300_s5 + $0x18] sm:$0xff] }
  0x17   : > { %s1872_s29 = sshll.u32 %s3331_s15, 2  ;;  %2107 = vmatprep.subr.bf16.mxu1 %v2297_v4  ;;  %2291 = vset.pattern.permute.xlu0 %v2399_v5  ;;  %v281_v15 = vld [vmem:[%s3300_s5] sm:$0xff]  ;;  %v2309_v17 = vld [vmem:[%s3296_s1 + $0x48] sm:$0xff]   ;;  %v300_v24 = vld [vmem:[%s3301_s6 + $0x18] sm:$0xff]  ;;  %s2400_s15 = smov [#allocation2]  }
  0x18   : > { %s2513_s16 = scalar_lea.vmem %s3295_s0, %s1872_s29  ;;  %830 = vperm.xlu1 %2292, %v283_v14   ;;  %820 = vperm.xlu0 %2291, %v281_v15   ;;  %v282_v19 = vld [vmem:[%s3300_s5 + $0x8] sm:$0xff]  ;;  %v2312_v22 = vld [vmem:[%s3296_s1 + $0x40] sm:$0xff]   ;;  %v299_v27 = vld [vmem:[%s3301_s6 + $0x10] sm:$0xff]  ;;  %s2341_s17 = sshll.u32 %s2400_s15, 4  ;;  %s2342_s17 = int_to_ptr.vmem [resolvable:$false] %s2341_s17 }
  0x19   : > { %2084 = vmatpush3.bf16.msra.mxu0 %v2294_v1  ;;  %v2516_v7 = vld [vmem:[%s2513_s16] sm:$0xff]   ;;  %v2532_v11 = vld [vmem:[%s2513_s16 + $0x8] sm:$0xff]   ;;  %v2535_v12 = vld [vmem:[%s2513_s16 + $0x10] sm:$0xff]   ;;  %s2343_s18 = scalar_lea.vmem %s2342_s17, 4096 }
  0x1a   : > { %2085 = vmatprep.subr.bf16.mxu0 %v2296_v3  ;;  %2108 = vmatpush3.bf16.msra.mxu1 %v2297_v4  ;;  %v2305_v18 = vld [vmem:[%s2513_s16 + $0x18] sm:$0xff]   ;;  %v2307_v20 = vld [vmem:[%s2513_s16 + $0x20] sm:$0xff]   ;;  %v298_v21 = vld [vmem:[%s3301_s6 + $0x8] sm:$0xff] }
  0x1b   : > { %2089 = vmatprep.mubr.msk.bf16.mxu0 %vm401_vm0, %v2516_v7  ;;  %2109 = vmatprep.subr.bf16.mxu1 %v2299_v6  ;;  %v297_v23 = vld [vmem:[%s3301_s6] sm:$0xff]  ;;  %v2308_v25 = vld [vmem:[%s2513_s16 + $0x28] sm:$0xff]   ;;  %v2310_v26 = vld [vmem:[%s2513_s16 + $0x30] sm:$0xff]  }
  0x1c   : > { %2113 = vmatprep.mubr.msk.bf16.mxu1 %vm401_vm0, %v2516_v7  ;;  %835 = vperm.xlu1 %2292, %v284_v16   ;;  %v286_v28 = vld [vmem:[%s3300_s5 + $0x28] sm:$0xff]  ;;  %v285_v29 = vld [vmem:[%s3300_s5 + $0x20] sm:$0xff]  ;;  %v288_v30 = vld [vmem:[%s3300_s5 + $0x38] sm:$0xff] }
  0x1d   : > { %2086 = vmatpush3.bf16.msra.mxu0 %v2296_v3  ;;  %825 = vperm.xlu0 %2291, %v282_v19   ;;  %v2311_v31 = vld [vmem:[%s2513_s16 + $0x38] sm:$0xff]   ;;  %v287_v32 = vld [vmem:[%s3300_s5 + $0x30] sm:$0xff]  ;;  %v302_v33 = vld [vmem:[%s3301_s6 + $0x28] sm:$0xff]  ;;  %s270_s16 = sand.u32 1, %s2389_s25  }
  0x1e   : > { %2087 = vmatprep.subr.bf16.mxu0 %v2298_v8  ;;  %2110 = vmatpush3.bf16.msra.mxu1 %v2299_v6  ;;  %v301_v34 = vld [vmem:[%s3301_s6 + $0x20] sm:$0xff]  ;;  %v304_v35 = vld [vmem:[%s3301_s6 + $0x38] sm:$0xff]  ;;  %v303_v36 = vld [vmem:[%s3301_s6 + $0x30] sm:$0xff]  ;;  %s1870_s21 = sshll.u32 %s270_s16, 7  ;;  %s3255_s28 = scalar_lea.sflag [#allocation3], %s270_s16 }
  0x1f   : > { %2111 = vmatprep.subr.bf16.mxu1 %v2303_v9  ;;  %v290_v37 = vld [vmem:[%s3300_s5 + $0x48] sm:$0xff]  ;;  %v289_v38 = vld [vmem:[%s3300_s5 + $0x40] sm:$0xff]  ;;  %v292_v39 = vld [vmem:[%s3300_s5 + $0x58] sm:$0xff]  ;;  %s3146_s22 = scalar_lea.vmem [#allocation2], %s1870_s21 }
  0x20   : > { %954 = vperm.xlu1 %2292, %v298_v21   ;;  %v291_v40 = vld [vmem:[%s3300_s5 + $0x50] sm:$0xff]  ;;  %v306_v41 = vld [vmem:[%s3301_s6 + $0x48] sm:$0xff]  ;;  %v305_v42 = vld [vmem:[%s3301_s6 + $0x40] sm:$0xff]  ;;  %s1804_s29 = sshll.u32 %s3146_s22, 4  ;;  %s3247_s29 = int_to_ptr.vmem [resolvable:$true] %s1804_s29 }
  0x21   : > { %2088 = vmatpush3.bf16.msra.mxu0 %v2298_v8  ;;  %949 = vperm.xlu0 %2291, %v297_v23   ;;  %v308_v43 = vld [vmem:[%s3301_s6 + $0x58] sm:$0xff]  ;;  %v307_v44 = vld [vmem:[%s3301_s6 + $0x50] sm:$0xff]  ;;  %v294_v45 = vld [vmem:[%s3300_s5 + $0x68] sm:$0xff]  ;;  %s2337_s14 = scalar_lea.vmem %s3247_s29, 2048  ;;  %p2344_p0 = scmp.lt.s32.totalorder %s3247_s29, %s2342_s17 }
  0x22   : > { %2129 = vmatprep.subr.bf16.mxu0 %v2302_v10  ;;  %2112 = vmatpush3.bf16.msra.mxu1 %v2303_v9  ;;  %v293_v46 = vld [vmem:[%s3300_s5 + $0x60] sm:$0xff]  ;;  %v296_v47 = vld [vmem:[%s3300_s5 + $0x78] sm:$0xff]  ;;  %v295_v48 = vld [vmem:[%s3300_s5 + $0x70] sm:$0xff]  ;;  %p2338_p11 = scmp.ne.s32.totalorder %s3247_s29, %s2337_s14  ;;  %p2345_p1 = scmp.lt.s32.totalorder %s2343_s18, %s2337_s14 }
  0x23   : > { %v310_v49 = vld [vmem:[%s3301_s6 + $0x68] sm:$0xff]  ;;  %v309_v50 = vld [vmem:[%s3301_s6 + $0x60] sm:$0xff]  ;;  %v312_v51 = vld [vmem:[%s3301_s6 + $0x78] sm:$0xff] }
  0x24   : > { %2090 = vmatmul.mubr.msk.bf16.vlgmr.msra.gmra.mxu0 %vm401_vm0, %v2532_v11  ;;  %964 = vperm.xlu1 %2292, %v300_v24   ;;  %v311_v52 = vld [vmem:[%s3301_s6 + $0x70] sm:$0xff]  ;;  %v2313_v53 = vld [vmem:[%s3298_s3 + $0x38] sm:$0xff]   ;;  %v2317_v57 = vld [vmem:[%s3298_s3 + $0x28] sm:$0xff]   ;;  %p2339_p12 = pnand %p2338_p11, %p2481_p5  ;;  %p2346_p2 = por %p2345_p1, %p2344_p0 }
  0x25   : > { %2130 = vmatpush3.bf16.msra.mxu0 %v2302_v10  ;;  %2093 = vmatprep.mubr.msk.bf16.mxu0 %vm401_vm0, %v2535_v12  ;;  %v2314_v54 = vld [vmem:[%s3298_s3 + $0x78] sm:$0xff]   ;;  %v2315_v55 = vld [vmem:[%s3298_s3 + $0x30] sm:$0xff]   ;;  %v2318_v58 = vld [vmem:[%s3298_s3 + $0x68] sm:$0xff]  }
  0x26   : > { %2114 = vmatmul.mubr.msk.bf16.vlgmr.msra.gmra.mxu1 %vm401_vm0, %v2532_v11  ;;  %2131 = vmatprep.subr.bf16.mxu0 %v2306_v13  ;;  %v2316_v56 = vld [vmem:[%s3298_s3 + $0x70] sm:$0xff]   ;;  %v2319_v59 = vld [vmem:[%s3298_s3 + $0x20] sm:$0xff]   ;;  %v2321_v61 = vld [vmem:[%s3298_s3 + $0x18] sm:$0xff]   ;;  %p2340_p13 = pneg %p2339_p12 }
  0x27   : > { %2117 = vmatprep.mubr.msk.bf16.mxu1 %vm401_vm0, %v2535_v12  ;;  %959 = vperm.xlu0 %2291, %v299_v27   ;;  %v2320_v60 = vld [vmem:[%s3298_s3 + $0x60] sm:$0xff]   ;;  %v2322_v62 = vld [vmem:[%s3298_s3 + $0x58] sm:$0xff]   ;;  %v2323_v63 = vld [vmem:[%s3298_s3 + $0x10] sm:$0xff]  }
  0x28   : > { %845 = vperm.xlu1 %2292, %v286_v28   ;;  %2153 = vmatprep.subr.bf16.mxu1 %v2313_v53  ;;  %v2324_v0 = vld [vmem:[%s3298_s3 + $0x50] sm:$0xff]   ;;  %v2325_v1 = vld [vmem:[%s3298_s3 + $0x8] sm:$0xff]   ;;  %v2327_v3 = vld [vmem:[%s3298_s3] sm:$0xff]   ;;  %p2347_p3 = pnand %p2346_p2, %p2340_p13 }
  0x29   : > { %2132 = vmatpush3.bf16.msra.mxu0 %v2306_v13  ;;  %2154 = vmatpush3.bf16.msra.mxu1 %v2313_v53  ;;  %v2326_v2 = vld [vmem:[%s3298_s3 + $0x48] sm:$0xff]   ;;  %v2328_v4 = vld [vmem:[%s3298_s3 + $0x40] sm:$0xff]   ;;  %v2727_v5 = vld [vmem:[%s3298_s3 + $0xb8] sm:$0xff]  }
  0x2a   : > { %2133 = vmatprep.subr.bf16.mxu0 %v2309_v17  ;;  %2155 = vmatprep.subr.bf16.mxu1 %v2315_v55 }
  0x2b   : > { %840 = vperm.xlu0 %2291, %v285_v29  }
  0x2c   : > { %2094 = vmatmul.mubr.msk.bf16.gmra.mxu0 %vm401_vm0, %v2305_v18  ;;  %855 = vperm.xlu1 %2292, %v288_v30  }
  0x2d   : > { %2097 = vmatprep.mubr.msk.bf16.mxu0 %vm401_vm0, %v2307_v20  ;;  %2134 = vmatpush3.bf16.msra.mxu0 %v2309_v17 }
  0x2e   : > { %2118 = vmatmul.mubr.msk.bf16.gmra.mxu1 %vm401_vm0, %v2305_v18  ;;  %2135 = vmatprep.subr.bf16.mxu0 %v2312_v22 }
  0x2f   : > { %2121 = vmatprep.mubr.msk.bf16.mxu1 %vm401_vm0, %v2307_v20  ;;  %850 = vperm.xlu0 %2291, %v287_v32  }
  0x30   : > { %974 = vperm.xlu1 %2292, %v302_v33   ;;  %2156 = vmatpush3.bf16.msra.mxu1 %v2315_v55 }
  0x31   : > { %2136 = vmatpush3.bf16.msra.mxu0 %v2312_v22  ;;  %2157 = vmatprep.subr.bf16.mxu1 %v2317_v57 }
  0x32   : > { %2185 = vmatprep.subr.bf16.mxu0 %v2314_v54 }
  0x33   : > { %969 = vperm.xlu0 %2291, %v301_v34   ;;  %v799_v34 = vlaneseq }
  0x34   : > { %2098 = vmatmul.mubr.msk.bf16.gmra.mxu0 %vm401_vm0, %v2308_v25  ;;  %984 = vperm.xlu1 %2292, %v304_v35  }
  0x35   : > { %2101 = vmatprep.mubr.msk.bf16.mxu0 %vm401_vm0, %v2310_v26  ;;  %2158 = vmatpush3.bf16.msra.mxu1 %v2317_v57 }
  0x36   : > { %2122 = vmatmul.mubr.msk.bf16.gmra.mxu1 %vm401_vm0, %v2308_v25  ;;  %2159 = vmatprep.subr.bf16.mxu1 %v2319_v59 }
  0x37   : > { %2125 = vmatprep.mubr.msk.bf16.mxu1 %vm401_vm0, %v2310_v26  ;;  %979 = vperm.xlu0 %2291, %v303_v36  }
  0x38   : > { %865 = vperm.xlu1 %2292, %v290_v37  }
  0x39   : > { %2160 = vmatpush3.bf16.msra.mxu1 %v2319_v59 }
  0x3a   : > { %2161 = vmatprep.subr.bf16.mxu1 %v2321_v61 }
  0x3b   : > { %860 = vperm.xlu0 %2291, %v289_v38  }
  0x3c   : > { %2102 = vmatmul.mubr.msk.bf16.gmra.mxu0 %vm401_vm0, %v2311_v31  ;;  %875 = vperm.xlu1 %2292, %v292_v39   ;;  %v2778_v39 = vshrl.u32 %v799_v34, 7 }
  0x3d   : > { %2137 = vmatprep.mubr.msk.bf16.mxu0 %vm401_vm0, %v2516_v7  ;;  %2162 = vmatpush3.bf16.msra.mxu1 %v2321_v61 }
  0x3e   : > { %2126 = vmatmul.mubr.msk.bf16.gmra.mxu1 %vm401_vm0, %v2311_v31  ;;  %2163 = vmatprep.subr.bf16.mxu1 %v2323_v63  ;;  %vm801_vm1 = vcmp.lt.s32.totalorder %v2778_v39, 1  ;;  %vm930_vm2 = vcmp.lt.s32.totalorder %v2778_v39, 7 }
  0x3f   : > { %870 = vperm.xlu0 %2291, %v291_v40  }
  0x40   : > { %994 = vperm.xlu1 %2292, %v306_v41  }
  0x41   : > { %2164 = vmatpush3.bf16.msra.mxu1 %v2323_v63 }
  0x42   : > { %2165 = vmatprep.subr.bf16.mxu1 %v2325_v1 }
  0x43   : > { %989 = vperm.xlu0 %2291, %v305_v42  }
  0x44   : > { %2138 = vmatmul.mubr.msk.bf16.vlgmr.msra.gmra.mxu0 %vm401_vm0, %v2532_v11  ;;  %1004 = vperm.xlu1 %2292, %v308_v43  }
  0x45   : > { %2141 = vmatprep.mubr.msk.bf16.mxu0 %vm401_vm0, %v2535_v12  ;;  %2186 = vmatpush3.bf16.msra.mxu0 %v2314_v54 }
  0x46   : > { %2187 = vmatprep.subr.bf16.mxu0 %v2316_v56  ;;  %2166 = vmatpush3.bf16.msra.mxu1 %v2325_v1 }
  0x47   : > { %999 = vperm.xlu0 %2291, %v307_v44   ;;  %2167 = vmatprep.subr.bf16.mxu1 %v2327_v3 }
  0x48   : > { %885 = vperm.xlu1 %2292, %v294_v45  }
  0x49   : > { %2188 = vmatpush3.bf16.msra.mxu0 %v2316_v56 }
  0x4a   : > { %2189 = vmatprep.subr.bf16.mxu0 %v2318_v58  ;;  %2168 = vmatpush3.bf16.msra.mxu1 %v2327_v3 }
  0x4b   : > { %880 = vperm.xlu0 %2291, %v293_v46   ;;  %2217 = vmatprep.subr.bf16.mxu1 %v2727_v5 }
  0x4c   : > { %2142 = vmatmul.mubr.msk.bf16.gmra.mxu0 %vm401_vm0, %v2305_v18  ;;  %895 = vperm.xlu1 %2292, %v296_v47  }
  0x4d   : > { %2145 = vmatprep.mubr.msk.bf16.mxu0 %vm401_vm0, %v2307_v20  ;;  %2190 = vmatpush3.bf16.msra.mxu0 %v2318_v58 }
  0x4e   : > { %2191 = vmatprep.subr.bf16.mxu0 %v2320_v60 }
  0x4f   : > { %890 = vperm.xlu0 %2291, %v295_v48  }
  0x50   : > { %1014 = vperm.xlu1 %2292, %v310_v49  }
  0x51   : > { %2192 = vmatpush3.bf16.msra.mxu0 %v2320_v60 }
  0x52   : > { %2193 = vmatprep.subr.bf16.mxu0 %v2322_v62 }
  0x53   : > { %1009 = vperm.xlu0 %2291, %v309_v50  }
  0x54   : > { %2146 = vmatmul.mubr.msk.bf16.gmra.mxu0 %vm401_vm0, %v2308_v25  ;;  %1024 = vperm.xlu1 %2292, %v312_v51  }
  0x55   : > { %2149 = vmatprep.mubr.msk.bf16.mxu0 %vm401_vm0, %v2310_v26  ;;  %2194 = vmatpush3.bf16.msra.mxu0 %v2322_v62 }
  0x56   : > { %2195 = vmatprep.subr.bf16.mxu0 %v2324_v0 }
  0x57   : > { %1019 = vperm.xlu0 %2291, %v311_v52  }
  0x59   : > { %2196 = vmatpush3.bf16.msra.mxu0 %v2324_v0 }
  0x5a   : > { %2197 = vmatprep.subr.bf16.mxu0 %v2326_v2 }
  0x5c   : > { %2150 = vmatmul.mubr.msk.bf16.gmra.mxu0 %vm401_vm0, %v2311_v31 }
  0x5d   : > { %2198 = vmatpush3.bf16.msra.mxu0 %v2326_v2 }
  0x5e   : > { %2199 = vmatprep.subr.bf16.mxu0 %v2328_v4 }
  0x61   : > { %2200 = vmatpush3.bf16.msra.mxu0 %v2328_v4 }
  0x93   : > { %v2730_v6 = vpop.permute.xlu1 %830  ;;  %v2732_v7 = vpop.permute.xlu0 %820 }
  0x94   : > { %3311 = vst [vmem:[#allocation5_spill] sm:$0xff] %v2732_v7 }
  0x97   : > { %v2734_v8 = vpop.permute.xlu1 %835 }
  0x98   : > { %v2736_v9 = vpop.permute.xlu0 %825 }
  0x9b   : > { %v2738_v10 = vpop.permute.xlu1 %954 }
  0x9c   : > { %v2740_v11 = vpop.permute.xlu0 %949 }
  0x9f   : > { %v2742_v12 = vpop.permute.xlu1 %964 }
  0xa2   : > { %v2744_v13 = vpop.permute.xlu0 %959 }
  0xa3   : > { %3312 = vst [vmem:[#allocation6_spill] sm:$0xff] %v2744_v13  ;;  %v2746_v14 = vpop.permute.xlu1 %845 }
  0xa6   : > { %v2748_v15 = vpop.permute.xlu0 %840 }
  0xa7   : > { %v2750_v17 = vpop.permute.xlu1 %855 }
  0xaa   : > { %v2756_v20 = vpop.permute.xlu0 %850 }
  0xab   : > { %v2760_v24 = vpop.permute.xlu1 %974 }
  0xac   : > { %3313 = vst [vmem:[#allocation7_spill] sm:$0xff] %v2760_v24 }
  0xae   : > { %v2762_v27 = vpop.permute.xlu0 %969 }
  0xaf   : > { %3314 = vst [vmem:[#allocation8_spill] sm:$0xff] %v2762_v27  ;;  %v2766_v31 = vpop.permute.xlu1 %984 }
  0xb2   : > { %v2768_v33 = vpop.permute.xlu0 %979 }
  0xb3   : > { %v2776_v38 = vpop.permute.xlu1 %865 }
  0xb4   : > { %3315 = vst [vmem:[#allocation9_spill] sm:$0xff] %v2776_v38 }
  0xb6   : > { %v2782_v42 = vpop.permute.xlu0 %860 }
  0xb7   : > { %v2789_v47 = vpop.permute.xlu1 %875 }
  0xba   : > { %v2793_v51 = vpop.permute.xlu0 %870 }
  0xbb   : > { %v2805_v63 = vpop.permute.xlu1 %994 }
  0xe4   : > { %v2091_v16 = vpop.f32.mrf.mxu0 }
  0xe5   : > { %v785_v48 = vrot.slane %v2091_v16, 7 }
  0xe6   : > { %v2752_v18 = vpop.f32.mrf.mxu0  ;;  %v2754_v19 = vpop.f32.mrf.mxu1 }
  0xe7   : > { %v783_v56 = vrot.slane %v2752_v18, 7 }
  0xe8   : > { %v2092_v21 = vpop.f32.mrf.mxu0  ;;  %v2758_v22 = vpop.f32.mrf.mxu1 }
  0xe9   : > { %v786_v44 = vrot.slane %v2092_v21, 7  ;;  %v2816_v21 = vpop.permute.xlu0 %989 }
  0xea   : > { %v463_v23 = vpop.f32.mrf.mxu0  ;;  %v2116_v26 = vpop.f32.mrf.mxu1 }
  0xeb   : > { %v784_v49 = vrot.slane %v463_v23, 7  ;;  %v814_v52 = vsel %vm801_vm1, %v785_v48, %v786_v44 }
  0xec   : > { %v2095_v25 = vpop.f32.mrf.mxu0  ;;  %v2764_v29 = vpop.f32.mrf.mxu1  ;;  %v901_v61 = vmul.f32 %v2734_v8, %v814_v52 }
  0xed   : > { %v815_v57 = vsel %vm801_vm1, %v784_v49, %v785_v48  ;;  %v789_v60 = vrot.slane %v2095_v25, 7  ;;  %v816_v0 = vsel %vm801_vm1, %v783_v56, %v784_v49 }
  0xee   : > { %v476_v28 = vpop.f32.mrf.mxu0  ;;  %v2770_v35 = vpop.f32.mrf.mxu1  ;;  %v900_v4 = vmul.f32 %v2730_v6, %v815_v57 }
  0xef   : > { %v787_v53 = vrot.slane %v476_v28, 7  ;;  %v899_v28 = vmul.f32 %v2736_v9, %v816_v0 }
  0xf0   : > { %v2096_v30 = vpop.f32.mrf.mxu0  ;;  %v606_v40 = vpop.f32.mrf.mxu1  ;;  %v1045_v52 = vadd.f32 %v2754_v19, %v900_v4 }
  0xf1   : > { %v790_v58 = vrot.slane %v2096_v30, 7  ;;  %v813_v1 = vsel %vm801_vm1, %v786_v44, %v787_v53 }
  0xf2   : > { %v479_v32 = vpop.f32.mrf.mxu0  ;;  %v2120_v45 = vpop.f32.mrf.mxu1  ;;  %v902_v30 = vmul.f32 %v2748_v15, %v813_v1 }
  0xf3   : > { %v788_v59 = vrot.slane %v479_v32, 7  ;;  %v810_v25 = vsel %vm801_vm1, %v789_v60, %v790_v58 }
  0xf4   : > { %v2772_v36 = vpop.f32.mrf.mxu0  ;;  %v609_v54 = vpop.f32.mrf.mxu1  ;;  %v905_v57 = vmul.f32 %v2750_v17, %v810_v25 }
  0xf5   : > { %v811_v23 = vsel %vm801_vm1, %v788_v59, %v789_v60  ;;  %v812_v32 = vsel %vm801_vm1, %v787_v53, %v788_v59  ;;  %v793_v0 = vrot.slane %v2772_v36, 7 }
  0xf6   : > { %v2774_v37 = vpop.f32.mrf.mxu0  ;;  %v2814_v16 = vpop.f32.mrf.mxu1  ;;  %v904_v53 = vmul.f32 %v2756_v20, %v811_v23 }
  0xf7   : > { %v791_v2 = vrot.slane %v2774_v37, 7  ;;  %v2829_v37 = vadd.f32 %v2116_v26, %v901_v61  ;;  %v2842_v61 = vpop.permute.xlu1 %1004 }
  0xf8   : > { %v2780_v41 = vpop.f32.mrf.mxu0  ;;  %v622_v26 = vpop.f32.mrf.mxu1 }
  0xf9   : > { %v809_v48 = vsel %vm801_vm1, %v790_v58, %v791_v2  ;;  %v903_v58 = vmul.f32 %v2746_v14, %v812_v32  ;;  %v3316_v25 = vrot.slane %v2780_v41, 7 }
  0xfa   : > { %v2784_v43 = vpop.f32.mrf.mxu0  ;;  %v906_v19 = vmul.f32 %v2782_v42, %v809_v48  ;;  %v2124_v48 = vpop.f32.mrf.mxu1 }
  0xfb   : > { %v792_v59 = vrot.slane %v2784_v43, 7  ;;  %v2851_v43 = vpop.permute.xlu0 %999  ;;  %v806_v36 = vsel %vm801_vm1, %v793_v0, %v3316_v25 }
  0xfc   : > { %v2787_v46 = vpop.f32.mrf.mxu0 }
  0xfd   : > { %v808_v25 = vsel %vm801_vm1, %v791_v2, %v792_v59 }
  0xfe   : > { %v2791_v50 = vpop.f32.mrf.mxu0 }
 0x100   : > { %v2797_v55 = vpop.f32.mrf.mxu0 }
 0x101   : > { %v3303_v3 = vrot.slane %v2797_v55, 7 }
 0x102   : > { %v2803_v62 = vpop.f32.mrf.mxu0 }
 0x103   : > { %v817_v49 = vsel %vm801_vm1, %v3303_v3, %v783_v56  ;;  %v1044_v56 = vadd.f32 %v899_v28, %v2764_v29  ;;  %v2847_v3 = vadd.f32 %v902_v30, %v606_v40  ;;  %v2861_v40 = vadd.f32 %v2770_v35, %v904_v53 }
 0x104   : > { %v2139_v18 = vpop.f32.mrf.mxu0  ;;  %v898_v4 = vmul.f32 %v2732_v7, %v817_v49  ;;  %v2863_v28 = vadd.f32 %v2120_v45, %v905_v57  ;;  %v807_v30 = vsel %vm801_vm1, %v792_v59, %v793_v0  ;;  %v1048_v7 = vadd.f32 %v903_v58, %v609_v54  ;;  %v2880_v58 = vpop.permute.xlu1 %885 }
 0x105   : > { %v916_v1 = vrot.slane %v2139_v18, 1  ;;  %v909_v45 = vmul.f32 %v2789_v47, %v806_v36  ;;  %v908_v2 = vmul.f32 %v2793_v51, %v807_v30  ;;  %v2883_v59 = vadd.f32 %v906_v19, %v622_v26 }
 0x106   : > { %v2826_v34 = vpop.f32.mrf.mxu0  ;;  %v1043_v53 = vadd.f32 %v898_v4, %v2758_v22  ;;  %v907_v36 = vmul.f32 %v2776_v38, %v808_v25  ;;  %v2890_v22 = vld [vmem:[%s3297_s2] ss:$0 sm:$0xff]  ;;  %v795_v26 = vrot.slane %v2791_v50, 7 }
 0x107   : > { %v2897_v30 = vadd.f32 %v2124_v48, %v909_v45 }
 0x108   : > { %v2140_v60 = vpop.f32.mrf.mxu0 }
 0x109   : > { %v917_v44 = vrot.slane %v2140_v60, 1 }
 0x10a   : > { %v723_v23 = vpop.f32.mrf.mxu0 }
 0x10b   : > { %v943_v18 = vsel %vm930_vm2, %v916_v1, %v917_v44  ;;  %v915_v29 = vrot.slane %v723_v23, 1  ;;  %v3317_v23 = vrot.slane %v2826_v34, 1 }
 0x10c   : > { %v1029_v49 = vmul.f32 %v2744_v13, %v943_v18  ;;  %v2143_v60 = vpop.f32.mrf.mxu0  ;;  %v797_v13 = vrot.slane %v2787_v46, 7 }
 0x10d   : > { %v944_v32 = vsel %vm930_vm2, %v915_v29, %v916_v1  ;;  %v945_v35 = vsel %vm930_vm2, %v3317_v23, %v915_v29  ;;  %v625_v29 = vpop.f32.mrf.mxu1  ;;  %v920_v19 = vrot.slane %v2143_v60, 1 }
 0x10e   : > { %v1027_v57 = vmul.f32 %v2740_v11, %v945_v35  ;;  %v1028_v0 = vmul.f32 %v2738_v10, %v944_v32  ;;  %v736_v54 = vpop.f32.mrf.mxu0  ;;  %v1061_v1 = vadd.f32 %v1045_v52, %v1029_v49  ;;  %v2892_v35 = vpop.permute.xlu0 %880 }
 0x10f   : > { %v918_v18 = vrot.slane %v736_v54, 1 }
 0x110   : > { %v1059_v4 = vadd.f32 %v1043_v53, %v1027_v57  ;;  %v1060_v32 = vadd.f32 %v1044_v56, %v1028_v0  ;;  %v2144_v23 = vpop.f32.mrf.mxu0  ;;  %v2903_v56 = vadd.f32 %v2814_v16, %v908_v2  ;;  %v1084_v57 = vadd.f32 %v2890_v22, %v1061_v1 }
 0x111   : > { %v942_v52 = vsel %vm930_vm2, %v917_v44, %v918_v18  ;;  %v921_v46 = vrot.slane %v2144_v23, 1  ;;  %v2908_v44 = vpop.f32.mrf.mxu1  ;;  %v3318_v16 = vrot.slane %v2780_v41, 7 }
 0x112   : > { %v1030_v49 = vmul.f32 %v2742_v12, %v942_v52  ;;  %v739_v25 = vpop.f32.mrf.mxu0  ;;  %v1082_v54 = vadd.f32 %v2890_v22, %v1059_v4  ;;  %v1083_v53 = vadd.f32 %v2890_v22, %v1060_v32  ;;  %v2912_v52 = vpop.permute.xlu1 %895  ;;  %v2914_v32 = vadd.f32 %v907_v36, %v625_v29 }
 0x113   : > { %v939_v50 = vsel %vm930_vm2, %v920_v19, %v921_v46  ;;  %v919_v60 = vrot.slane %v739_v25, 1  ;;  %v805_v2 = vsel %vm801_vm1, %v3318_v16, %v795_v26 }
 0x114   : > { %v1062_v48 = vadd.f32 %v2829_v37, %v1030_v49  ;;  %v1033_v45 = vmul.f32 %v2768_v33, %v939_v50  ;;  %v2147_v0 = vpop.f32.mrf.mxu0  ;;  %v1098_v23 = vmax.f32 %v1082_v54, 0.0  ;;  %v1099_v4 = vmax.f32 %v1083_v53, 0.0  ;;  %v2931_v53 = vpop.permute.xlu0 %890 }
 0x115   : > { %v940_v1 = vsel %vm930_vm2, %v919_v60, %v920_v19  ;;  %v941_v37 = vsel %vm930_vm2, %v918_v18, %v919_v60  ;;  %v3319_v49 = vrot.slane %v2797_v55, 7  ;;  %v796_v50 = vrot.slane %v2803_v62, 7  ;;  %v2936_v18 = vpop.f32.mrf.mxu1 }
 0x116   : > { %v1085_v54 = vadd.f32 %v2890_v22, %v1062_v48  ;;  %v1031_v29 = vmul.f32 %v2762_v27, %v941_v37  ;;  %v1032_v41 = vmul.f32 %v2760_v24, %v940_v1  ;;  %v752_v36 = vpop.f32.mrf.mxu0  ;;  %v1100_v19 = vmax.f32 %v1084_v57, 0.0 }
 0x117   : > { %v802_v25 = vsel %vm801_vm1, %v797_v13, %v3319_v49  ;;  %v922_v16 = vrot.slane %v752_v36, 1  ;;  %v2934_v38 = vpack.c.bf16 %v1099_v4, %v1098_v23  ;;  %v1065_v60 = vadd.f32 %v2861_v40, %v1033_v45  ;;  %v2330_v40 = vld [vmem:[%s3298_s3 + $0xb0] sm:$0xff]   ;;  %v2953_v45 = vpop.permute.xlu1 %1014 }
 0x118   : > { %v1101_v55 = vmax.f32 %v1085_v54, 0.0  ;;  %v1063_v48 = vadd.f32 %v2847_v3, %v1031_v29  ;;  %v1064_v49 = vadd.f32 %v1048_v7, %v1032_v41  ;;  %v2148_v37 = vpop.f32.mrf.mxu0  ;;  %v913_v1 = vmul.f32 %v2912_v52, %v802_v25  ;;  %v2128_v54 = vpop.f32.mrf.mxu1 }
 0x119   : > { %v924_v24 = vrot.slane %v2147_v0, 1  ;;  %v938_v27 = vsel %vm930_vm2, %v921_v46, %v922_v16  ;;  %v925_v62 = vrot.slane %v2148_v37, 1  ;;  %2169 = vmatprep.mubr.bf16.mxu1 %v2934_v38  ;;  %2201 = vmatprep.mubr.bf16.mxu0 %v2934_v38  ;;  %v803_v46 = vsel %vm801_vm1, %v796_v50, %v797_v13  ;;  %v2965_v13 = vpop.permute.xlu0 %1009 }
 0x11a   : > { %v1034_v57 = vmul.f32 %v2766_v31, %v938_v27  ;;  %v755_v23 = vpop.f32.mrf.mxu0  ;;  %v2946_v4 = vpack.c.bf16 %v1101_v55, %v1100_v19  ;;  %v1086_v3 = vadd.f32 %v2890_v22, %v1063_v48  ;;  %v1087_v7 = vadd.f32 %v2890_v22, %v1064_v49 }
 0x11b   : > { %v804_v0 = vsel %vm801_vm1, %v795_v26, %v796_v50  ;;  %v935_v27 = vsel %vm930_vm2, %v924_v24, %v925_v62  ;;  %v923_v25 = vrot.slane %v755_v23, 1  ;;  %v1088_v55 = vadd.f32 %v2890_v22, %v1065_v60 }
 0x11c   : > { %v1066_v29 = vadd.f32 %v2863_v28, %v1034_v57  ;;  %v2151_v41 = vpop.f32.mrf.mxu0  ;;  %2170 = vmatmul.mubr.bf16.vlgmr.msra.gmra.mxu1 %v2946_v4  ;;  %2202 = vmatmul.mubr.bf16.vlgmr.msra.gmra.mxu0 %v2946_v4  ;;  %v1102_v36 = vmax.f32 %v1086_v3, 0.0  ;;  %v1103_v19 = vmax.f32 %v1087_v7, 0.0  ;;  %v910_v26 = vmul.f32 %v2892_v35, %v805_v2  ;;  %v2331_v2 = vld [vmem:[%s3298_s3 + $0xa8] sm:$0xff]  }
 0x11d   : > { %v1037_v50 = vmul.f32 %v2851_v43, %v935_v27  ;;  %v936_v48 = vsel %vm930_vm2, %v923_v25, %v924_v24  ;;  %v937_v28 = vsel %vm930_vm2, %v922_v16, %v923_v25  ;;  %2218 = vmatpush3.bf16.msra.mxu1 %v2727_v5  ;;  %v912_v49 = vmul.f32 %v2931_v53, %v803_v46 }
 0x11e   : > { %v1035_v37 = vmul.f32 %v2816_v21, %v937_v28  ;;  %v1036_v60 = vmul.f32 %v2805_v63, %v936_v48  ;;  %v768_v57 = vpop.f32.mrf.mxu0  ;;  %v2977_v23 = vpack.c.bf16 %v1103_v19, %v1102_v36  ;;  %2219 = vmatprep.subr.bf16.mxu1 %v2330_v40  ;;  %v1058_v24 = vadd.f32 %v2128_v54, %v913_v1  ;;  %v2997_v28 = vpop.permute.xlu0 %1019 }
 0x11f   : > { %v911_v3 = vmul.f32 %v2880_v58, %v804_v0  ;;  %v926_v16 = vrot.slane %v768_v57, 1  ;;  %v1089_v5 = vadd.f32 %v2890_v22, %v1066_v29  ;;  %v928_v27 = vrot.slane %v2151_v41, 1  ;;  %v2991_v29 = vpop.permute.xlu1 %1024 }
 0x120   : > { %v1067_v7 = vadd.f32 %v2883_v59, %v1035_v37  ;;  %v1068_v46 = vadd.f32 %v2914_v32, %v1036_v60  ;;  %v2152_v25 = vpop.f32.mrf.mxu0  ;;  %2173 = vmatprep.mubr.bf16.mxu1 %v2977_v23  ;;  %2205 = vmatprep.mubr.bf16.mxu0 %v2977_v23  ;;  %v1104_v36 = vmax.f32 %v1088_v55, 0.0  ;;  %v1069_v19 = vadd.f32 %v2903_v56, %v1037_v50  ;;  %v641_v56 = vpop.f32.mrf.mxu1  ;;  %v2332_v37 = vld [vmem:[%s3298_s3 + $0xa0] sm:$0xff]  }
 0x121   : > { %v934_v1 = vsel %vm930_vm2, %v925_v62, %v926_v16  ;;  %v929_v0 = vrot.slane %v2152_v25, 1  ;;  %2220 = vmatpush3.bf16.msra.mxu1 %v2330_v40  ;;  %v1105_v54 = vmax.f32 %v1089_v5, 0.0  ;;  %v1057_v59 = vadd.f32 %v2908_v44, %v912_v49 }
 0x122   : > { %v1038_v32 = vmul.f32 %v2842_v61, %v934_v1  ;;  %v771_v41 = vpop.f32.mrf.mxu0  ;;  %2221 = vmatprep.subr.bf16.mxu1 %v2331_v2  ;;  %v1090_v48 = vadd.f32 %v2890_v22, %v1067_v7  ;;  %v1091_v55 = vadd.f32 %v2890_v22, %v1068_v46  ;;  %v3320_v40 = vrot.slane %v2826_v34, 1 }
 0x123   : > { %v931_v62 = vsel %vm930_vm2, %v928_v27, %v929_v0  ;;  %v927_v44 = vrot.slane %v771_v41, 1  ;;  %v1117_v49 = vpack.c.bf16 %v1105_v54, %v1104_v36  ;;  %v1092_v36 = vadd.f32 %v2890_v22, %v1069_v19 }
 0x124   : > { %v946_v50 = vsel %vm930_vm2, %v929_v0, %v3320_v40  ;;  %v1070_v60 = vadd.f32 %v2897_v30, %v1038_v32  ;;  %v1041_v57 = vmul.f32 %v2997_v28, %v931_v62  ;;  %v1106_v7 = vmax.f32 %v1090_v48, 0.0 }
 0x125   : > { %v1042_v5 = vmul.f32 %v2991_v29, %v946_v50  ;;  %v932_v46 = vsel %vm930_vm2, %v927_v44, %v928_v27  ;;  %v933_v34 = vsel %vm930_vm2, %v926_v16, %v927_v44  ;;  %2174 = vmatmul.mubr.bf16.gmra.mxu1 %v1117_v49  ;;  %2206 = vmatmul.mubr.bf16.gmra.mxu0 %v1117_v49  ;;  %v1107_v25 = vmax.f32 %v1091_v55, 0.0  ;;  %v2333_v16 = vld [vmem:[%s3298_s3 + $0x98] sm:$0xff]  }
 0x126   : > { %v1055_v1 = vadd.f32 %v910_v26, %v2936_v18  ;;  %v1056_v0 = vadd.f32 %v911_v3, %v641_v56  ;;  %v1039_v30 = vmul.f32 %v2965_v13, %v933_v34  ;;  %v1040_v54 = vmul.f32 %v2953_v45, %v932_v46  ;;  %2222 = vmatpush3.bf16.msra.mxu1 %v2331_v2 }
 0x127   : > { %v1073_v32 = vadd.f32 %v1057_v59, %v1041_v57  ;;  %v1074_v41 = vadd.f32 %v1058_v24, %v1042_v5  ;;  %v1118_v48 = vpack.c.bf16 %v1107_v25, %v1106_v7  ;;  %2223 = vmatprep.subr.bf16.mxu1 %v2332_v37  ;;  %v1093_v27 = vadd.f32 %v2890_v22, %v1070_v60  ;;  %v2334_v59 = vld [vmem:[%s3298_s3 + $0x90] sm:$0xff]   ;;  %v2335_v57 = vld [vmem:[%s3298_s3 + $0x88] sm:$0xff]  }
 0x128   : > { %v1071_v55 = vadd.f32 %v1055_v1, %v1039_v30  ;;  %v1072_v19 = vadd.f32 %v1056_v0, %v1040_v54  ;;  %v1108_v18 = vmax.f32 %v1092_v36, 0.0 }
 0x129   : > { %2177 = vmatprep.mubr.bf16.mxu1 %v1118_v48  ;;  %2209 = vmatprep.mubr.bf16.mxu0 %v1118_v48  ;;  %v1109_v26 = vmax.f32 %v1093_v27, 0.0  ;;  %v1096_v56 = vadd.f32 %v2890_v22, %v1073_v32  ;;  %v1097_v62 = vadd.f32 %v2890_v22, %v1074_v41 }
 0x12a   : > { %2224 = vmatpush3.bf16.msra.mxu1 %v2332_v37  ;;  %v1094_v3 = vadd.f32 %v2890_v22, %v1071_v55  ;;  %v1095_v2 = vadd.f32 %v2890_v22, %v1072_v19  ;;  %v2336_v22 = vld [vmem:[%s3298_s3 + $0x80] sm:$0xff]  }
 0x12b   : > { %v1119_v24 = vpack.c.bf16 %v1109_v26, %v1108_v18  ;;  %2225 = vmatprep.subr.bf16.mxu1 %v2333_v16  ;;  %v1112_v37 = vmax.f32 %v1096_v56, 0.0  ;;  %v1113_v60 = vmax.f32 %v1097_v62, 0.0 }
 0x12c   : > { %v1110_v40 = vmax.f32 %v1094_v3, 0.0  ;;  %v1111_v50 = vmax.f32 %v1095_v2, 0.0 }
 0x12d   : > { %2178 = vmatmul.mubr.bf16.gmra.mxu1 %v1119_v24  ;;  %2210 = vmatmul.mubr.bf16.gmra.mxu0 %v1119_v24  ;;  %v1121_v5 = vpack.c.bf16 %v1113_v60, %v1112_v37 }
 0x12e   : > { %2226 = vmatpush3.bf16.msra.mxu1 %v2333_v16  ;;  %v1120_v44 = vpack.c.bf16 %v1111_v50, %v1110_v40 }
 0x12f   : > { %2227 = vmatprep.subr.bf16.mxu1 %v2334_v59 }
 0x130   : > { %2181 = vmatprep.mubr.bf16.mxu1 %v1120_v44  ;;  %2213 = vmatprep.mubr.bf16.mxu0 %v1120_v44 }
 0x132   : > { %2228 = vmatpush3.bf16.msra.mxu1 %v2334_v59 }
 0x133   : > { %2229 = vmatprep.subr.bf16.mxu1 %v2335_v57 }
 0x135   : > { %2182 = vmatmul.mubr.bf16.gmra.mxu1 %v1121_v5  ;;  %2214 = vmatmul.mubr.bf16.gmra.mxu0 %v1121_v5 }
 0x136   : > { %2230 = vmatpush3.bf16.msra.mxu1 %v2335_v57  ;;  %2233 = vmatprep.mubr.bf16.mxu1 %v2934_v38 }
 0x137   : > { %2231 = vmatprep.subr.bf16.mxu1 %v2336_v22 }
 0x13a   : > { %2232 = vmatpush3.bf16.msra.mxu1 %v2336_v22 }
 0x13d   : > { %2234 = vmatmul.mubr.bf16.vlgmr.msra.gmra.mxu1 %v2946_v4 }
 0x13e   : > { %2237 = vmatprep.mubr.bf16.mxu1 %v2977_v23 }
 0x145   : > { %2238 = vmatmul.mubr.bf16.gmra.mxu1 %v1117_v49 }
 0x146   : > { %2241 = vmatprep.mubr.bf16.mxu1 %v1118_v48 }
 0x14d   : > { %2242 = vmatmul.mubr.bf16.gmra.mxu1 %v1119_v24 }
 0x14e   : > { %2245 = vmatprep.mubr.bf16.mxu1 %v1120_v44 }
 0x155   : > { %2246 = vmatmul.mubr.bf16.gmra.mxu1 %v1121_v5 }
 0x1dc   : > { %v2171_v7 = vpop.f32.mrf.mxu1  ;;  %v2203_v34 = vpop.f32.mrf.mxu0 }
 0x1dd   : > { %v1609_v18 = vrot.slane %v2171_v7, 7 }
 0x1de   : > { %v1220_v46 = vpop.f32.mrf.mxu1  ;;  %v3039_v1 = vpop.f32.mrf.mxu0 }
 0x1df   : > { %v1607_v62 = vrot.slane %v1220_v46, 7 }
 0x1e0   : > { %v2172_v25 = vpop.f32.mrf.mxu1  ;;  %v2204_v38 = vpop.f32.mrf.mxu0 }
 0x1e1   : > { %v1610_v55 = vrot.slane %v2172_v25, 7 }
 0x1e2   : > { %v1223_v36 = vpop.f32.mrf.mxu1  ;;  %v1385_v32 = vpop.f32.mrf.mxu0 }
 0x1e3   : > { %v1608_v26 = vrot.slane %v1223_v36, 7  ;;  %v1635_v24 = vsel %vm801_vm1, %v1609_v18, %v1610_v55 }
 0x1e4   : > { %v1642_v37 = vmul.f32 %v1635_v24, %v2734_v8 }
 0x1e5   : > { %v2175_v0 = vpop.f32.mrf.mxu1  ;;  %v2207_v23 = vpop.f32.mrf.mxu0  ;;  %v1636_v40 = vsel %vm801_vm1, %v1608_v26, %v1609_v18  ;;  %v1637_v22 = vsel %vm801_vm1, %v1607_v62, %v1608_v26 }
 0x1e6   : > { %v1613_v7 = vrot.slane %v2175_v0, 7  ;;  %v1641_v36 = vmul.f32 %v1636_v40, %v2730_v6  ;;  %v3083_v26 = vadd.f32 %v2204_v38, %v1642_v37 }
 0x1e7   : > { %v1236_v30 = vpop.f32.mrf.mxu1  ;;  %v1398_v27 = vpop.f32.mrf.mxu0 }
 0x1e8   : > { %v1611_v59 = vrot.slane %v1236_v30, 7 }
 0x1e9   : > { %v2176_v54 = vpop.f32.mrf.mxu1  ;;  %v2208_v3 = vpop.f32.mrf.mxu0 }
 0x1ea   : > { %v1614_v50 = vrot.slane %v2176_v54, 7  ;;  %v1634_v25 = vsel %vm801_vm1, %v1610_v55, %v1611_v59 }
 0x1eb   : > { %v1239_v4 = vpop.f32.mrf.mxu1  ;;  %v1401_v60 = vpop.f32.mrf.mxu0 }
 0x1ec   : > { %v1612_v44 = vrot.slane %v1239_v4, 7  ;;  %v1631_v8 = vsel %vm801_vm1, %v1613_v7, %v1614_v50  ;;  %v1640_v4 = vmul.f32 %v1637_v22, %v2736_v9  ;;  %v1705_v9 = vadd.f32 %v2203_v34, %v1641_v36  ;;  %v3321_v36 = vld [vmem:[#allocation5_spill] sm:$0xff] }
 0x1ed   : > { %v3041_v41 = vpop.f32.mrf.mxu1  ;;  %v3077_v18 = vpop.f32.mrf.mxu0 }
 0x1ee   : > { %v1632_v54 = vsel %vm801_vm1, %v1612_v44, %v1613_v7  ;;  %v1633_v0 = vsel %vm801_vm1, %v1611_v59, %v1612_v44  ;;  %v1704_v7 = vadd.f32 %v1640_v4, %v1385_v32 }
 0x1ef   : > { %v3043_v49 = vpop.f32.mrf.mxu1  ;;  %v1645_v59 = vmul.f32 %v1632_v54, %v2756_v20  ;;  %v1414_v34 = vpop.f32.mrf.mxu0 }
 0x1f0   : > { %v1615_v57 = vrot.slane %v3043_v49, 7  ;;  %v1643_v49 = vmul.f32 %v1634_v25, %v2748_v15  ;;  %v1646_v15 = vmul.f32 %v1631_v8, %v2750_v17 }
 0x1f1   : > { %v3045_v48 = vpop.f32.mrf.mxu1  ;;  %v1709_v32 = vadd.f32 %v2207_v23, %v1645_v59 }
 0x1f2   : > { %v1630_v55 = vsel %vm801_vm1, %v1614_v50, %v1615_v57  ;;  %v1618_v40 = vrot.slane %v3045_v48, 7  ;;  %v1644_v50 = vmul.f32 %v1633_v0, %v2746_v14  ;;  %v3094_v25 = vadd.f32 %v1643_v49, %v1398_v27  ;;  %v3322_v27 = vld [vmem:[#allocation6_spill] sm:$0xff] }
 0x1f3   : > { %v3047_v16 = vpop.f32.mrf.mxu1  ;;  %v1647_v22 = vmul.f32 %v1630_v55, %v2782_v42  ;;  %v3115_v55 = vld [vmem:[%s3299_s4] ss:$0 sm:$0xff] }
 0x1f4   : > { %v1616_v20 = vrot.slane %v3047_v16, 7  ;;  %v1708_v16 = vadd.f32 %v1644_v50, %v1401_v60 }
 0x1f5   : > { %v3049_v19 = vpop.f32.mrf.mxu1  ;;  %v3110_v0 = vadd.f32 %v1647_v22, %v1414_v34 }
 0x1f6   : > { %v1629_v34 = vsel %vm801_vm1, %v1615_v57, %v1616_v20 }
 0x1f7   : > { %v3051_v2 = vpop.f32.mrf.mxu1 }
 0x1f9   : > { %v3055_v56 = vpop.f32.mrf.mxu1 }
 0x1fa   : > { %v1622_v46 = vrot.slane %v3055_v56, 7 }
 0x1fb   : > { %v3061_v5 = vpop.f32.mrf.mxu1 }
 0x1fc   : > { %v1638_v24 = vsel %vm801_vm1, %v1622_v46, %v1607_v62  ;;  %v1617_v62 = vrot.slane %v3041_v41, 7 }
 0x1fd   : > { %v2235_v30 = vpop.f32.mrf.mxu1  ;;  %v1639_v17 = vmul.f32 %v1638_v24, %v3321_v36  ;;  %v2212_v24 = vpop.f32.mrf.mxu0 }
 0x1fe   : > { %v1657_v38 = vrot.slane %v2235_v30, 1  ;;  %v3103_v30 = vadd.f32 %v2208_v3, %v1646_v15  ;;  %v1627_v41 = vsel %vm801_vm1, %v1617_v62, %v1618_v40 }
 0x1ff   : > { %v3081_v6 = vpop.f32.mrf.mxu1  ;;  %v1703_v15 = vadd.f32 %v1639_v17, %v3039_v1  ;;  %v1650_v22 = vmul.f32 %v1627_v41, %v2789_v47  ;;  %v1417_v41 = vpop.f32.mrf.mxu0 }
 0x200   : > { %v1655_v54 = vrot.slane %v3081_v6, 1 }
 0x201   : > { %v2236_v44 = vpop.f32.mrf.mxu1 }
 0x202   : > { %v1658_v37 = vrot.slane %v2236_v44, 1 }
 0x203   : > { %v1547_v8 = vpop.f32.mrf.mxu1 }
 0x204   : > { %v1683_v14 = vsel %vm930_vm2, %v1657_v38, %v1658_v37  ;;  %v1656_v42 = vrot.slane %v1547_v8, 1  ;;  %v1621_v8 = vrot.slane %v3049_v19, 7 }
 0x205   : > { %v1689_v4 = vmul.f32 %v1683_v14, %v3322_v27  ;;  %v2239_v49 = vpop.f32.mrf.mxu1 }
 0x206   : > { %v1684_v3 = vsel %vm930_vm2, %v1656_v42, %v1657_v38  ;;  %v1685_v23 = vsel %vm930_vm2, %v1655_v54, %v1656_v42  ;;  %v1628_v38 = vsel %vm801_vm1, %v1616_v20, %v1617_v62 }
 0x207   : > { %v1721_v60 = vadd.f32 %v1705_v9, %v1689_v4  ;;  %v1687_v59 = vmul.f32 %v1685_v23, %v2740_v11  ;;  %v1688_v44 = vmul.f32 %v1684_v3, %v2738_v10  ;;  %v1560_v50 = vpop.f32.mrf.mxu1  ;;  %v1619_v11 = vrot.slane %v3051_v2, 7 }
 0x208   : > { %v1659_v36 = vrot.slane %v1560_v50, 1  ;;  %v1661_v10 = vrot.slane %v2239_v49, 1  ;;  %v3141_v4 = vadd.f32 %v2212_v24, %v1650_v22  ;;  %v3162_v22 = vpop.f32.mrf.mxu0 }
 0x209   : > { %v1744_v1 = vadd.f32 %v3115_v55, %v1721_v60  ;;  %v1719_v17 = vadd.f32 %v1703_v15, %v1687_v59  ;;  %v1720_v9 = vadd.f32 %v1704_v7, %v1688_v44  ;;  %v2240_v14 = vpop.f32.mrf.mxu1  ;;  %v1649_v7 = vmul.f32 %v1628_v38, %v2793_v51  ;;  %v3323_v60 = vld [vmem:[#allocation9_spill] sm:$0xff]  ;;  %v3324_v38 = vld [vmem:[#allocation8_spill] sm:$0xff] }
 0x20a   : > { %v1682_v47 = vsel %vm930_vm2, %v1658_v37, %v1659_v36  ;;  %v1662_v42 = vrot.slane %v2240_v14, 1  ;;  %v1648_v59 = vmul.f32 %v1629_v34, %v3323_v60  ;;  %v1626_v51 = vsel %vm801_vm1, %v1618_v40, %v1619_v11 }
 0x20b   : > { %v1760_v62 = vmax.f32 %v1744_v1, 0.0  ;;  %v1742_v27 = vadd.f32 %v3115_v55, %v1719_v17  ;;  %v1743_v57 = vadd.f32 %v3115_v55, %v1720_v9  ;;  %v1690_v19 = vmul.f32 %v1682_v47, %v2742_v12  ;;  %v1563_v20 = vpop.f32.mrf.mxu1  ;;  %v3325_v1 = vld [vmem:[#allocation7_spill] sm:$0xff] }
 0x20c   : > { %v1679_v49 = vsel %vm930_vm2, %v1661_v10, %v1662_v42  ;;  %v1660_v3 = vrot.slane %v1563_v20, 1  ;;  %v1713_v40 = vadd.f32 %v3077_v18, %v1649_v7  ;;  %v1620_v9 = vrot.slane %v3061_v5, 7  ;;  %v1430_v20 = vpop.f32.mrf.mxu0 }
 0x20d   : > { %1776 = vst [vmem:[%s3146_s22 + $0x10] sm:$0xff] %v1760_v62  ;;  %v1758_v37 = vmax.f32 %v1742_v27, 0.0  ;;  %v1759_v23 = vmax.f32 %v1743_v57, 0.0  ;;  %v1722_v15 = vadd.f32 %v3083_v26, %v1690_v19  ;;  %v1693_v12 = vmul.f32 %v1679_v49, %v2768_v33  ;;  %v2243_v24 = vpop.f32.mrf.mxu1 }
 0x20e   : > { %v1680_v44 = vsel %vm930_vm2, %v1660_v3, %v1661_v10  ;;  %v1681_v50 = vsel %vm930_vm2, %v1659_v36, %v1660_v3  ;;  %v1623_v36 = vsel %vm801_vm1, %v1621_v8, %v1622_v46  ;;  %v1651_v57 = vmul.f32 %v1626_v51, %v2892_v35  ;;  %v2216_v51 = vpop.f32.mrf.mxu0 }
 0x20f   : > { %1774 = vst [vmem:[%s3146_s22] sm:$0xff] %v1758_v37  ;;  %1775 = vst [vmem:[%s3146_s22 + $0x8] sm:$0xff] %v1759_v23  ;;  %v1745_v33 = vadd.f32 %v3115_v55, %v1722_v15  ;;  %v1725_v26 = vadd.f32 %v1709_v32, %v1693_v12  ;;  %v1691_v34 = vmul.f32 %v1681_v50, %v3324_v38  ;;  %v1576_v17 = vpop.f32.mrf.mxu1  ;;  %v1665_v19 = vrot.slane %v2243_v24, 1 }
 0x210   : > { %v1692_v48 = vmul.f32 %v1680_v44, %v3325_v1  ;;  %v1663_v14 = vrot.slane %v1576_v17, 1  ;;  %v1624_v35 = vsel %vm801_vm1, %v1620_v9, %v1621_v8  ;;  %v1712_v24 = vadd.f32 %v1648_v59, %v1417_v41 }
 0x211   : > { %v1761_v10 = vmax.f32 %v1745_v33, 0.0  ;;  %v1748_v47 = vadd.f32 %v3115_v55, %v1725_v26  ;;  %v1723_v32 = vadd.f32 %v3094_v25, %v1691_v34  ;;  %v2244_v27 = vpop.f32.mrf.mxu1  ;;  %v1715_v59 = vadd.f32 %v1651_v57, %v1430_v20 }
 0x212   : > { %v1724_v62 = vadd.f32 %v1708_v16, %v1692_v48  ;;  %v1678_v56 = vsel %vm930_vm2, %v1662_v42, %v1663_v14  ;;  %v1666_v18 = vrot.slane %v2244_v27, 1  ;;  %v1654_v16 = vmul.f32 %v1623_v36, %v2912_v52 }
 0x213   : > { %1777 = vst [vmem:[%s3146_s22 + $0x18] sm:$0xff] %v1761_v10  ;;  %v1764_v46 = vmax.f32 %v1748_v47, 0.0  ;;  %v1746_v5 = vadd.f32 %v3115_v55, %v1723_v32  ;;  %v1694_v49 = vmul.f32 %v1678_v56, %v2766_v31  ;;  %v1579_v25 = vpop.f32.mrf.mxu1  ;;  %v1625_v52 = vsel %vm801_vm1, %v1619_v11, %v1620_v9 }
 0x214   : > { %v1747_v7 = vadd.f32 %v3115_v55, %v1724_v62  ;;  %v1675_v42 = vsel %vm930_vm2, %v1665_v19, %v1666_v18  ;;  %v1664_v3 = vrot.slane %v1579_v25, 1  ;;  %v1718_v11 = vadd.f32 %v2216_v51, %v1654_v16  ;;  %v1433_v62 = vpop.f32.mrf.mxu0 }
 0x215   : > { %1780 = vst [vmem:[%s3146_s22 + $0x30] sm:$0xff] %v1764_v46  ;;  %v1762_v37 = vmax.f32 %v1746_v5, 0.0  ;;  %v1726_v15 = vadd.f32 %v3103_v30, %v1694_v49  ;;  %v1697_v12 = vmul.f32 %v1675_v42, %v2851_v43  ;;  %v2247_v31 = vpop.f32.mrf.mxu1  ;;  %v1653_v50 = vmul.f32 %v1624_v35, %v2931_v53 }
 0x216   : > { %v1763_v23 = vmax.f32 %v1747_v7, 0.0  ;;  %v1676_v8 = vsel %vm930_vm2, %v1664_v3, %v1665_v19  ;;  %v1677_v60 = vsel %vm930_vm2, %v1663_v14, %v1664_v3  ;;  %v1652_v17 = vmul.f32 %v1625_v52, %v2880_v58 }
 0x217   : > { %1778 = vst [vmem:[%s3146_s22 + $0x20] sm:$0xff] %v1762_v37  ;;  %v1749_v30 = vadd.f32 %v3115_v55, %v1726_v15  ;;  %v1729_v44 = vadd.f32 %v1713_v40, %v1697_v12  ;;  %v1695_v43 = vmul.f32 %v1677_v60, %v2816_v21  ;;  %v1696_v2 = vmul.f32 %v1676_v8, %v2805_v63  ;;  %v1592_v41 = vpop.f32.mrf.mxu1 }
 0x218   : > { %1779 = vst [vmem:[%s3146_s22 + $0x28] sm:$0xff] %v1763_v23  ;;  %v1667_v33 = vrot.slane %v1592_v41, 1  ;;  %v1669_v21 = vrot.slane %v2247_v31, 1  ;;  %v1717_v10 = vadd.f32 %v3162_v22, %v1653_v50  ;;  %v1716_v56 = vadd.f32 %v1652_v17, %v1433_v62 }
 0x219   : > { %v1765_v26 = vmax.f32 %v1749_v30, 0.0  ;;  %v1752_v38 = vadd.f32 %v3115_v55, %v1729_v44  ;;  %v1727_v34 = vadd.f32 %v3110_v0, %v1695_v43  ;;  %v1728_v1 = vadd.f32 %v1712_v24, %v1696_v2  ;;  %v2248_v48 = vpop.f32.mrf.mxu1 }
 0x21a   : > { %v1674_v63 = vsel %vm930_vm2, %v1666_v18, %v1667_v33  ;;  %v1670_v40 = vrot.slane %v2248_v48, 1 }
 0x21b   : > { %1781 = vst [vmem:[%s3146_s22 + $0x38] sm:$0xff] %v1765_v26  ;;  %v1768_v36 = vmax.f32 %v1752_v38, 0.0  ;;  %v1750_v53 = vadd.f32 %v3115_v55, %v1727_v34  ;;  %v1751_v9 = vadd.f32 %v3115_v55, %v1728_v1  ;;  %v1698_v14 = vmul.f32 %v1674_v63, %v2842_v61  ;;  %v1595_v0 = vpop.f32.mrf.mxu1 }
 0x21c   : > { %v1671_v58 = vsel %vm930_vm2, %v1669_v21, %v1670_v40  ;;  %v1686_v47 = vsel %vm930_vm2, %v1670_v40, %v1655_v54  ;;  %v1668_v32 = vrot.slane %v1595_v0, 1 }
 0x21d   : > { %1784 = vst [vmem:[%s3146_s22 + $0x50] sm:$0xff] %v1768_v36  ;;  %v1766_v27 = vmax.f32 %v1750_v53, 0.0  ;;  %v1767_v57 = vmax.f32 %v1751_v9, 0.0  ;;  %v1730_v61 = vadd.f32 %v3141_v4, %v1698_v14  ;;  %v1701_v19 = vmul.f32 %v1671_v58, %v2997_v28 }
 0x21e   : > { %v1702_v22 = vmul.f32 %v1686_v47, %v2991_v29  ;;  %v1672_v6 = vsel %vm930_vm2, %v1668_v32, %v1669_v21  ;;  %v1673_v54 = vsel %vm930_vm2, %v1667_v33, %v1668_v32 }
 0x21f   : > { %1782 = vst [vmem:[%s3146_s22 + $0x40] sm:$0xff] %v1766_v27  ;;  %1783 = vst [vmem:[%s3146_s22 + $0x48] sm:$0xff] %v1767_v57  ;;  %v1753_v18 = vadd.f32 %v3115_v55, %v1730_v61  ;;  %v1733_v20 = vadd.f32 %v1717_v10, %v1701_v19  ;;  %v1699_v4 = vmul.f32 %v1673_v54, %v2965_v13 }
 0x220   : > { %v1700_v28 = vmul.f32 %v1672_v6, %v2953_v45  ;;  %v1734_v46 = vadd.f32 %v1718_v11, %v1702_v22 }
 0x221   : > { %v1769_v5 = vmax.f32 %v1753_v18, 0.0  ;;  %v1756_v29 = vadd.f32 %v3115_v55, %v1733_v20  ;;  %v1731_v7 = vadd.f32 %v1715_v59, %v1699_v4 }
 0x222   : > { %v1732_v39 = vadd.f32 %v1716_v56, %v1700_v28  ;;  %v1757_v49 = vadd.f32 %v3115_v55, %v1734_v46 }
 0x223   : > { %1785 = vst [vmem:[%s3146_s22 + $0x58] sm:$0xff] %v1769_v5  ;;  %v1772_v13 = vmax.f32 %v1756_v29, 0.0  ;;  %v1754_v45 = vadd.f32 %v3115_v55, %v1731_v7 }
 0x224   : > { %v1755_v25 = vadd.f32 %v3115_v55, %v1732_v39  ;;  %v1773_v16 = vmax.f32 %v1757_v49, 0.0 }
 0x225   : > { %1788 = vst [vmem:[%s3146_s22 + $0x70] sm:$0xff] %v1772_v13  ;;  %v1770_v35 = vmax.f32 %v1754_v45, 0.0 }
 0x226   : > { %v1771_v42 = vmax.f32 %v1755_v25, 0.0  ;;  %1789 = vst [vmem:[%s3146_s22 + $0x78] sm:$0xff] %v1773_v16 }
 0x227   : > { %1786 = vst [vmem:[%s3146_s22 + $0x60] sm:$0xff] %v1770_v35 }
 0x228   : > { %1787 = vst [vmem:[%s3146_s22 + $0x68] sm:$0xff] %v1771_v42 }
 0x229   : > { %2350 = shalt.err (!%p2347_p3)
}
 0x22a   : > { %s2351_s16 = scalar_lea.hbm %s3245_s13, 2048  ;;  %s2355_s21 = scalar_lea.hbm %s3302_s7, 4096 }
 0x22b   : > { %p2352_p4 = scmp.ne.s32.totalorder %s3245_s13, %s2351_s16  ;;  %p2356_p9 = scmp.lt.s32.totalorder %s3245_s13, %s3302_s7 }
 0x22c   : > { %p2357_p10 = scmp.lt.s32.totalorder %s2355_s21, %s2351_s16 }
 0x22d   : > { %p2353_p7 = pnand %p2352_p4, %p2481_p5 }
 0x22e   : > { %p2358_p11 = por %p2357_p10, %p2356_p9 }
 0x22f   : > { %p2354_p8 = pneg %p2353_p7 }
 0x231   : > { %p2359_p12 = pnand %p2358_p11, %p2354_p8 }
 0x233   : > { %2362 = shalt.err (!%p2359_p12)
}
 0x234   : > { %s2401_s8 = smov 128   ;;  %s2402_s9 = smov 8  }
 0x235   : > { %2249 = dma.vmem_to_hbm [thread:$0]  (%p2481_p5), %s3247_s29, 2048, %s3245_s13, %s3255_s28, %s2401_s8, %s2401_s8, %s2402_s9  }
 0x236 PF: > { %p2255_p13 = scmp.ge.s32.totalorder %s2397_s27, 2  ;;  %s1819_s14 = sand.u32 1, %s2385_s24  }
 0x237   : > { %s1820_s15 = scalar_lea.sflag [#allocation3], %s1819_s14 }
 0x238   : > { %p2252_p0 = pnand %p2255_p13, %p2485_p6 }
 0x23a   : > { %p2253_p1 = pneg %p2252_p0 }
 0x23c   : > { %2380 = dma.done.wait (%p2253_p1), %s1820_s15, 2048  }
 0x23d   : > { %2382 = vsyncadd (%p2253_p1), %s1820_s15, 4294965248  ;;  %p17_p2 = scmp.ge.s32.totalorder %s2468_s30, 4   ;;  %s3326_s24 = smov %s2389_s25 }
 0x23e   : > { %s3327_s25 = smov %s2393_s26  ;;  %s3328_s26 = smov %s2479_s10 }
 0x23f   : > { %s3329_s27 = smov %s2468_s30  ;;  %19 = sbr.rel (!%p17_p2) target bundleno = 3 (0x3), region = 87 }
 0x244   :  { %1825 = vsyncpa [#allocation3], 1 }
 0x245   :  { %1827 = vsyncpa [#allocation3 + $0x1], 1 }

</bundles_post_ra>
